<compile_context>
chip_gen: v5e
topology: v5e:2x2
jax: 0.10.0
libtpu: 0.0.40
codegen_flags: <defaults>
</compile_context>

<pallas_src>
import jax
import jax.numpy as jnp
from jax.experimental import pallas as pl
from jax.experimental.pallas import tpu as pltpu


def _fm_kernel(x_ref, o_ref):
    # x_ref: (Bt, F, E) block in VMEM ; o_ref: (Bt, 1)
    Bt, F, E = x_ref.shape

    if F <= 64:
        # Unrolled accumulation over the field axis: pure VPU adds/muls,
        # avoids the cross-sublane XLU reduction entirely.
        x0 = x_ref[:, 0, :].astype(jnp.float32)        # (Bt, E)
        s = x0
        ss = x0 * x0
        for f in range(1, F):
            xf = x_ref[:, f, :].astype(jnp.float32)
            s = s + xf
            ss = ss + xf * xf
    else:
        # Fallback for very large field counts (keeps code size bounded).
        x = x_ref[...].astype(jnp.float32)
        s = jnp.sum(x, axis=1)
        ss = jnp.sum(x * x, axis=1)

    cross = s * s - ss                                  # (Bt, E)
    # Single lane (embedding-axis) reduction on the XLU.
    out = 0.5 * jnp.sum(cross, axis=-1, keepdims=True)  # (Bt, 1)
    o_ref[...] = out.astype(o_ref.dtype)


def fm_forward(x, block_batch=None):
    """x: (B, F, E) array -> (B, 1) array, matching FM.forward."""
    B, F, E = x.shape
    itemsize = jnp.dtype(x.dtype).itemsize

    # --- choose batch tile: ~4 MiB per input tile, multiple of 8 rows ---
    if block_batch is None:
        target_tile_bytes = 4 * 1024 * 1024
        row_bytes = max(1, F * E * itemsize)
        bt = max(1, target_tile_bytes // row_bytes)
        bt = int(min(bt, B))
        bt = max(8, (bt // 8) * 8)          # multiple of 8, at least 8
    else:
        bt = int(block_batch)

    num_tiles = -(-B // bt)                 # ceil div
    b_pad = num_tiles * bt
    if b_pad != B:
        # Zero rows contribute exactly 0 to the cross term; sliced off below.
        x = jnp.pad(x, ((0, b_pad - B), (0, 0), (0, 0)))

    cost = pl.CostEstimate(
        flops=3 * b_pad * F * E,
        transcendentals=0,
        bytes_accessed=b_pad * F * E * itemsize + b_pad * itemsize,
    )

    out = pl.pallas_call(
        _fm_kernel,
        out_shape=jax.ShapeDtypeStruct((b_pad, 1), x.dtype),
        grid=(num_tiles,),
        in_specs=[pl.BlockSpec((bt, F, E), lambda i: (i, 0, 0))],
        out_specs=pl.BlockSpec((bt, 1), lambda i: (i, 0)),
        compiler_params=pltpu.CompilerParams(
            dimension_semantics=("parallel",),
        ),
        cost_estimate=cost,
    )(x)

    return out[:B]


def fm_reference(x):
    """Pure-JAX reference mirroring the PyTorch code exactly."""
    square_of_sum = jnp.power(jnp.sum(x, axis=1, keepdims=True), 2)
    sum_of_square = jnp.sum(x * x, axis=1, keepdims=True)
    cross_term = square_of_sum - sum_of_square
    cross_term = 0.5 * jnp.sum(cross_term, axis=2)
    return cross_term  # (B, 1)


if __name__ == "__main__":
    key = jax.random.PRNGKey(0)

    # Small shape matching the module's convention (batch, field, embedding).
    batch_size, field_size, embedding_size = 2, 4, 32
    x = jax.random.normal(
        key, (batch_size, field_size, embedding_size), dtype=jnp.float32
    )
    out = jax.block_until_ready(fm_forward(x))
    ref = fm_reference(x)
    assert out.shape == (batch_size, 1), out.shape
    assert jnp.allclose(out, ref, atol=1e-5, rtol=1e-5), (out, ref)

    # Second check: multi-tile grid + non-multiple batch (exercises padding,
    # pipelining and the "parallel" grid axis).
    k2 = jax.random.PRNGKey(1)
    x2 = jax.random.normal(k2, (37, 8, 128), dtype=jnp.float32)
    out2 = jax.block_until_ready(fm_forward(x2, block_batch=16))
    ref2 = fm_reference(x2)
    assert out2.shape == (37, 1), out2.shape
    assert jnp.allclose(out2, ref2, atol=1e-4, rtol=1e-4)

    print("KERNEL_OK")
</pallas_src>

<mosaic_0001>
module attributes {stable_mosaic.version = 11 : i64} {
  func.func @_fm_kernel(%arg0: i32, %arg1: memref<8x4x32xf32, #tpu.memory_space<vmem>>, %arg2: memref<8x1xf32, #tpu.memory_space<vmem>>) attributes {dimension_semantics = [#tpu.dimension_semantics<parallel>], iteration_bounds = array<i64: 1>, scalar_prefetch = 0 : i64, scratch_operands = 0 : i64, tpu.core_type = #tpu.core_type<tc>, window_params = [{transform_indices = @transform_0, window_bounds = array<i64: 8, 4, 32>}, {transform_indices = @transform_1, window_bounds = array<i64: 8, 1>}]} {
    %c0 = arith.constant 0 : index
    %c0_0 = arith.constant 0 : index
    %c0_1 = arith.constant 0 : index
    %0 = vector.load %arg1[%c0, %c0_0, %c0_1] : memref<8x4x32xf32, #tpu.memory_space<vmem>>, vector<8x1x32xf32>
    %1 = vector.shape_cast %0 : vector<8x1x32xf32> to vector<8x32xf32>
    %2 = arith.mulf %1, %1 : vector<8x32xf32>
    %c0_2 = arith.constant 0 : index
    %c1 = arith.constant 1 : index
    %c0_3 = arith.constant 0 : index
    %3 = vector.load %arg1[%c0_2, %c1, %c0_3] : memref<8x4x32xf32, #tpu.memory_space<vmem>>, vector<8x1x32xf32>
    %4 = vector.shape_cast %3 : vector<8x1x32xf32> to vector<8x32xf32>
    %5 = arith.addf %1, %4 : vector<8x32xf32>
    %6 = arith.mulf %4, %4 : vector<8x32xf32>
    %7 = arith.addf %2, %6 : vector<8x32xf32>
    %c0_4 = arith.constant 0 : index
    %c2 = arith.constant 2 : index
    %c0_5 = arith.constant 0 : index
    %8 = vector.load %arg1[%c0_4, %c2, %c0_5] : memref<8x4x32xf32, #tpu.memory_space<vmem>>, vector<8x1x32xf32>
    %9 = vector.shape_cast %8 : vector<8x1x32xf32> to vector<8x32xf32>
    %10 = arith.addf %5, %9 : vector<8x32xf32>
    %11 = arith.mulf %9, %9 : vector<8x32xf32>
    %12 = arith.addf %7, %11 : vector<8x32xf32>
    %c0_6 = arith.constant 0 : index
    %c3 = arith.constant 3 : index
    %c0_7 = arith.constant 0 : index
    %13 = vector.load %arg1[%c0_6, %c3, %c0_7] : memref<8x4x32xf32, #tpu.memory_space<vmem>>, vector<8x1x32xf32>
    %14 = vector.shape_cast %13 : vector<8x1x32xf32> to vector<8x32xf32>
    %15 = arith.addf %10, %14 : vector<8x32xf32>
    %16 = arith.mulf %14, %14 : vector<8x32xf32>
    %17 = arith.addf %12, %16 : vector<8x32xf32>
    %18 = arith.mulf %15, %15 : vector<8x32xf32>
    %19 = arith.subf %18, %17 : vector<8x32xf32>
    %cst = arith.constant dense<0.000000e+00> : vector<8xf32>
    %20 = vector.multi_reduction <add>, %19, %cst [1] : vector<8x32xf32> to vector<8xf32>
    %21 = vector.shape_cast %20 : vector<8xf32> to vector<8x1xf32>
    %cst_8 = arith.constant 5.000000e-01 : f32
    %22 = vector.broadcast %cst_8 : f32 to vector<8x1xf32>
    %23 = arith.mulf %22, %21 : vector<8x1xf32>
    %c0_9 = arith.constant 0 : index
    %c0_10 = arith.constant 0 : index
    %24 = vector.load %arg2[%c0_9, %c0_10] : memref<8x1xf32, #tpu.memory_space<vmem>>, vector<8x1xf32>
    tpu.vector_store %arg2[%c0_9, %c0_10], %23 {strides = array<i32>} : memref<8x1xf32, #tpu.memory_space<vmem>>, vector<8x1xf32>,
    return
  }
  func.func @transform_0(%arg0: i32) -> (i32, i32, i32) {
    %c0_i32 = arith.constant 0 : i32
    %c0_i32_0 = arith.constant 0 : i32
    %c0_i32_1 = arith.constant 0 : i32
    return %arg0, %c0_i32, %c0_i32_0 : i32, i32, i32
  }
  func.func @transform_1(%arg0: i32) -> (i32, i32) {
    %c0_i32 = arith.constant 0 : i32
    %c0_i32_0 = arith.constant 0 : i32
    return %arg0, %c0_i32 : i32, i32
  }
}

</mosaic_0001>

<bundles_post_ra>
// kernel: tpu_custom_call.1
= control target key start
LH: loop header
LB: loop body
LE: loop exit
PB: predicated region body
PF: predicated region fallthrough
CT: control target
= control target key end

     0   :  { %6 = vsyncpa [#allocation3], 0  ;;  %s223_s9 = smov [#allocation2]   ;;  %s224_s11 = smov 64   ;;  %s243_s0 = inlined_call_operand.hbm [shape: f32[8,4,32], index: 0, kind: input, shape index: {}]   ;;  %s244_s1 = inlined_call_operand.vmem [shape: f32[8,1], index: 1, kind: output, shape index: {}]  }
   0x1   :  { %s11_s8 = sshll.u32 %s243_s0, 4  ;;  %s13_s10 = sshll.u32 %s223_s9, 4  ;;  %s12_s8 = int_to_ptr.hbm [resolvable:$true] %s11_s8  ;;  %s14_s10 = int_to_ptr.vmem [resolvable:$true] %s13_s10 }
   0x2   :  { %s225_s12 = smov 4  }
   0x3   :  { %19 = dma.hbm_to_vmem [thread:$0]  %s12_s8, 512, %s14_s10, [#allocation3], %s224_s11, %s224_s11, %s225_s12  }
   0x4   :  { %221 = dma.done.wait [#allocation3], 512  }
   0x5   :  { %222 = vsyncadd [#allocation3], 4294966784  ;;  %v24_v0 = vld [vmem:[#allocation2] sm:$0x1]  ;;  %v25_v1 = vld [vmem:[#allocation2 + $0x4] sm:$0x1] }
   0x6   :  { %v26_v2 = vld [vmem:[#allocation2 + $0x8] sm:$0x1]  ;;  %v27_v3 = vld [vmem:[#allocation2 + $0xc] sm:$0x1]  ;;  %v28_v4 = vld [vmem:[#allocation2 + $0x10] sm:$0x1]  ;;  %v32_v6 = vmul.f32 %v24_v0, %v24_v0  ;;  %v33_v7 = vmul.f32 %v25_v1, %v25_v1 }
   0x7   :  { %v29_v5 = vld [vmem:[#allocation2 + $0x14] sm:$0x1]  ;;  %v30_v8 = vld [vmem:[#allocation2 + $0x18] sm:$0x1]  ;;  %v31_v9 = vld [vmem:[#allocation2 + $0x1c] sm:$0x1]  ;;  %v34_v10 = vmul.f32 %v26_v2, %v26_v2  ;;  %v35_v11 = vmul.f32 %v27_v3, %v27_v3  ;;  %v36_v12 = vmul.f32 %v28_v4, %v28_v4 }
   0x8   :  { %v37_v13 = vmul.f32 %v29_v5, %v29_v5  ;;  %v40_v14 = vld [vmem:[#allocation2 + $0x1] sm:$0x1]  ;;  %v38_v15 = vmul.f32 %v30_v8, %v30_v8  ;;  %v39_v16 = vmul.f32 %v31_v9, %v31_v9  ;;  %v41_v17 = vld [vmem:[#allocation2 + $0x5] sm:$0x1]  ;;  %v42_v18 = vld [vmem:[#allocation2 + $0x9] sm:$0x1] }
   0x9   :  { %v43_v19 = vld [vmem:[#allocation2 + $0xd] sm:$0x1]  ;;  %v48_v20 = vadd.f32 %v40_v14, %v24_v0  ;;  %v56_v21 = vmul.f32 %v40_v14, %v40_v14  ;;  %v44_v22 = vld [vmem:[#allocation2 + $0x11] sm:$0x1]  ;;  %v45_v23 = vld [vmem:[#allocation2 + $0x15] sm:$0x1]  ;;  %v49_v25 = vadd.f32 %v41_v17, %v25_v1  ;;  %v50_v26 = vadd.f32 %v42_v18, %v26_v2 }
   0xa   :  { %v46_v24 = vld [vmem:[#allocation2 + $0x19] sm:$0x1]  ;;  %v51_v27 = vadd.f32 %v43_v19, %v27_v3  ;;  %v57_v28 = vmul.f32 %v41_v17, %v41_v17  ;;  %v47_v29 = vld [vmem:[#allocation2 + $0x1d] sm:$0x1]  ;;  %v52_v30 = vadd.f32 %v44_v22, %v28_v4  ;;  %v53_v31 = vadd.f32 %v45_v23, %v29_v5  ;;  %v72_v38 = vld [vmem:[#allocation2 + $0x2] sm:$0x1] }
   0xb   :  { %v54_v32 = vadd.f32 %v46_v24, %v30_v8  ;;  %v58_v33 = vmul.f32 %v42_v18, %v42_v18  ;;  %v55_v34 = vadd.f32 %v47_v29, %v31_v9  ;;  %v59_v35 = vmul.f32 %v43_v19, %v43_v19  ;;  %v73_v39 = vld [vmem:[#allocation2 + $0x6] sm:$0x1]  ;;  %v74_v40 = vld [vmem:[#allocation2 + $0xa] sm:$0x1]  ;;  %v75_v45 = vld [vmem:[#allocation2 + $0xe] sm:$0x1] }
   0xc   :  { %v60_v36 = vmul.f32 %v44_v22, %v44_v22  ;;  %v61_v37 = vmul.f32 %v45_v23, %v45_v23  ;;  %v62_v41 = vmul.f32 %v46_v24, %v46_v24  ;;  %v63_v42 = vmul.f32 %v47_v29, %v47_v29  ;;  %v76_v46 = vld [vmem:[#allocation2 + $0x12] sm:$0x1]  ;;  %v77_v47 = vld [vmem:[#allocation2 + $0x16] sm:$0x1]  ;;  %v78_v52 = vld [vmem:[#allocation2 + $0x1a] sm:$0x1] }
   0xd   :  { %v64_v43 = vadd.f32 %v56_v21, %v32_v6  ;;  %v65_v44 = vadd.f32 %v57_v28, %v33_v7  ;;  %v66_v48 = vadd.f32 %v58_v33, %v34_v10  ;;  %v67_v49 = vadd.f32 %v59_v35, %v35_v11  ;;  %v79_v53 = vld [vmem:[#allocation2 + $0x1e] sm:$0x1]  ;;  %v104_v6 = vld [vmem:[#allocation2 + $0x3] sm:$0x1]  ;;  %v105_v7 = vld [vmem:[#allocation2 + $0x7] sm:$0x1] }
   0xe   :  { %v68_v50 = vadd.f32 %v60_v36, %v36_v12  ;;  %v69_v51 = vadd.f32 %v61_v37, %v37_v13  ;;  %v70_v54 = vadd.f32 %v62_v41, %v38_v15  ;;  %v71_v55 = vadd.f32 %v63_v42, %v39_v16  ;;  %v106_v8 = vld [vmem:[#allocation2 + $0xb] sm:$0x1]  ;;  %v107_v13 = vld [vmem:[#allocation2 + $0xf] sm:$0x1]  ;;  %v108_v14 = vld [vmem:[#allocation2 + $0x13] sm:$0x1] }
   0xf   :  { %v80_v56 = vadd.f32 %v72_v38, %v48_v20  ;;  %v81_v57 = vadd.f32 %v73_v39, %v49_v25  ;;  %v82_v58 = vadd.f32 %v74_v40, %v50_v26  ;;  %v83_v59 = vadd.f32 %v75_v45, %v51_v27  ;;  %v109_v15 = vld [vmem:[#allocation2 + $0x17] sm:$0x1]  ;;  %v110_v20 = vld [vmem:[#allocation2 + $0x1b] sm:$0x1]  ;;  %v111_v21 = vld [vmem:[#allocation2 + $0x1f] sm:$0x1] }
  0x10   :  { %v84_v60 = vadd.f32 %v76_v46, %v52_v30  ;;  %v85_v61 = vadd.f32 %v77_v47, %v53_v31  ;;  %v86_v62 = vadd.f32 %v78_v52, %v54_v32  ;;  %v87_v63 = vadd.f32 %v79_v53, %v55_v34 }
  0x11   :  { %v88_v0 = vmul.f32 %v72_v38, %v72_v38  ;;  %v89_v1 = vmul.f32 %v73_v39, %v73_v39  ;;  %v90_v2 = vmul.f32 %v74_v40, %v74_v40  ;;  %v91_v3 = vmul.f32 %v75_v45, %v75_v45 }
  0x12   :  { %v92_v4 = vmul.f32 %v76_v46, %v76_v46  ;;  %v93_v5 = vmul.f32 %v77_v47, %v77_v47  ;;  %v94_v9 = vmul.f32 %v78_v52, %v78_v52  ;;  %v95_v10 = vmul.f32 %v79_v53, %v79_v53 }
  0x13   :  { %v96_v11 = vadd.f32 %v88_v0, %v64_v43  ;;  %v97_v12 = vadd.f32 %v89_v1, %v65_v44  ;;  %v98_v16 = vadd.f32 %v90_v2, %v66_v48  ;;  %v99_v17 = vadd.f32 %v91_v3, %v67_v49 }
  0x14   :  { %v100_v18 = vadd.f32 %v92_v4, %v68_v50  ;;  %v101_v19 = vadd.f32 %v93_v5, %v69_v51  ;;  %v102_v22 = vadd.f32 %v94_v9, %v70_v54  ;;  %v103_v23 = vadd.f32 %v95_v10, %v71_v55 }
  0x15   :  { %v112_v24 = vadd.f32 %v104_v6, %v80_v56  ;;  %v113_v25 = vadd.f32 %v105_v7, %v81_v57  ;;  %v114_v26 = vadd.f32 %v106_v8, %v82_v58  ;;  %v115_v27 = vadd.f32 %v107_v13, %v83_v59 }
  0x16   :  { %v116_v28 = vadd.f32 %v108_v14, %v84_v60  ;;  %v117_v29 = vadd.f32 %v109_v15, %v85_v61  ;;  %vm161_vm0 = vcmask 1041409   ;;  %v118_v30 = vadd.f32 %v110_v20, %v86_v62 }
  0x17   :  { %v119_v31 = vadd.f32 %v111_v21, %v87_v63  ;;  %v120_v32 = vmul.f32 %v104_v6, %v104_v6  ;;  %v121_v33 = vmul.f32 %v105_v7, %v105_v7  ;;  %v122_v34 = vmul.f32 %v106_v8, %v106_v8 }
  0x18   :  { %v123_v35 = vmul.f32 %v107_v13, %v107_v13  ;;  %v124_v36 = vmul.f32 %v108_v14, %v108_v14  ;;  %v125_v37 = vmul.f32 %v109_v15, %v109_v15  ;;  %v126_v38 = vmul.f32 %v110_v20, %v110_v20 }
  0x19   :  { %v127_v39 = vmul.f32 %v111_v21, %v111_v21  ;;  %v128_v40 = vadd.f32 %v120_v32, %v96_v11  ;;  %v129_v41 = vadd.f32 %v121_v33, %v97_v12  ;;  %v130_v42 = vadd.f32 %v122_v34, %v98_v16 }
  0x1a   :  { %v131_v43 = vadd.f32 %v123_v35, %v99_v17  ;;  %v132_v44 = vadd.f32 %v124_v36, %v100_v18  ;;  %v133_v45 = vadd.f32 %v125_v37, %v101_v19  ;;  %v134_v46 = vadd.f32 %v126_v38, %v102_v22 }
  0x1b   :  { %v135_v47 = vadd.f32 %v127_v39, %v103_v23  ;;  %v136_v48 = vmul.f32 %v112_v24, %v112_v24  ;;  %v137_v49 = vmul.f32 %v113_v25, %v113_v25  ;;  %v138_v50 = vmul.f32 %v114_v26, %v114_v26 }
  0x1c   :  { %v139_v51 = vmul.f32 %v115_v27, %v115_v27  ;;  %v140_v52 = vmul.f32 %v116_v28, %v116_v28  ;;  %v141_v53 = vmul.f32 %v117_v29, %v117_v29  ;;  %v142_v54 = vmul.f32 %v118_v30, %v118_v30 }
  0x1d   :  { %v143_v55 = vmul.f32 %v119_v31, %v119_v31  ;;  %v144_v56 = vsub.f32 %v136_v48, %v128_v40  ;;  %v145_v57 = vsub.f32 %v137_v49, %v129_v41  ;;  %v146_v58 = vsub.f32 %v138_v50, %v130_v42 }
  0x1e   :  { %v147_v59 = vsub.f32 %v139_v51, %v131_v43  ;;  %v148_v60 = vsub.f32 %v140_v52, %v132_v44  ;;  %v149_v61 = vsub.f32 %v141_v53, %v133_v45  ;;  %v150_v62 = vsub.f32 %v142_v54, %v134_v46 }
  0x1f   :  { %v151_v63 = vsub.f32 %v143_v55, %v135_v47  ;;  %v160_v0 = vrot.slane %v145_v57, 7  ;;  %vm164_vm1 = vcmask 1042434   ;;  %v163_v1 = vrot.slane %v146_v58, 6 }
  0x20   :  { %v166_v2 = vrot.slane %v147_v59, 5  ;;  %vm167_vm2 = vcmask 1043459   ;;  %v169_v3 = vrot.slane %v148_v60, 4  ;;  %vm170_vm3 = vcmask 1044484  }
  0x21   :  { %v162_v4 = vsel %vm161_vm0, %v160_v0, %v144_v56  ;;  %v172_v5 = vrot.slane %v149_v61, 3  ;;  %vm173_vm4 = vcmask 1045509   ;;  %v175_v7 = vrot.slane %v150_v62, 2 }
  0x22   :  { %v165_v6 = vsel %vm164_vm1, %v163_v1, %v162_v4  ;;  %vm176_vm5 = vcmask 1046534   ;;  %v178_v9 = vrot.slane %v151_v63, 1  ;;  %vm179_vm6 = vcmask 1047559  }
  0x23   :  { %v168_v8 = vsel %vm167_vm2, %v166_v2, %v165_v6  ;;  %vm182_vm7 = vcmask 261120   ;;  %vm187_vm8 = vcmask 7168  }
  0x24   :  { %v171_v10 = vsel %vm170_vm3, %v169_v3, %v168_v8 }
  0x25   :  { %v174_v11 = vsel %vm173_vm4, %v172_v5, %v171_v10 }
  0x26   :  { %v177_v12 = vsel %vm176_vm5, %v175_v7, %v174_v11 }
  0x27   :  { %v180_v13 = vsel %vm179_vm6, %v178_v9, %v177_v12 }
  0x28   :  { %v183_v14 = vsel %vm182_vm7, %v180_v13, 0.0 }
  0x29   :  { %184 = vadd.xlane.f32.xlu0 %v183_v14 }
  0x9c   :  { %v185_v15 = vpop.xlane.xlu0 %184 }
  0x9d   :  { %v186_v16 = vmul.f32 0.5, %v185_v15 }
  0x9f   :  { %188 = vst.msk [vmem:[%s244_s1] sm:$0xff] %vm187_vm8, %v186_v16 }
  0xa0   :  { %193 = vsyncpa [#allocation3], 1 }

</bundles_post_ra>
